<compile_context>
chip_gen: v6e
topology: v6e:2x2x1
jax: 0.10.0
libtpu: 0.0.40
codegen_flags: <defaults>
</compile_context>

<pallas_src>
import math
import functools

import jax
import jax.numpy as jnp
from jax.experimental import pallas as pl
from jax.experimental.pallas import tpu as pltpu

_MIB = 1024 * 1024


def _round_up(x, n):
    return (x + n - 1) // n * n


@functools.lru_cache(maxsize=1)
def _vmem_capacity_bytes():
    """Physical VMEM per TensorCore; conservative 64 MiB (v7x) fallback."""
    try:
        info = pltpu.get_tpu_info()
        cap = int(getattr(info, "vmem_capacity_bytes"))
        if cap > 0:
            return cap
    except Exception:
        pass
    return 64 * _MIB


# --------------------------------------------------------------------------- #
# Kernel                                                                      #
# --------------------------------------------------------------------------- #
def _ffn_kernel(x_ref, w1_ref, b1_ref, w2_ref, b2_ref, o_ref, acc_ref):
    """Grid step (i, k): token tile i x d_ff tile k.

    acc_ref holds the f32 (tile_m, d_model) partial of the second matmul;
    it is initialized with b2 at k == 0 and written to o_ref at the last k.
    """
    k = pl.program_id(1)

    @pl.when(k == 0)
    def _init():
        # Fold the second-layer bias into the accumulator init.
        acc_ref[...] = jnp.broadcast_to(
            b2_ref[...].astype(jnp.float32), acc_ref.shape)

    # ---- first linear (this d_ff slice): native-dtype MXU, f32 accumulate --
    h = jnp.dot(x_ref[...], w1_ref[...], preferred_element_type=jnp.float32)
    h = h + b1_ref[...].astype(jnp.float32)          # (1, tile_f) broadcasts

    # ---- GELU (tanh approximation, matches the reference GELU module) -----
    c = math.sqrt(2.0 / math.pi)
    h = 0.5 * h * (1.0 + jnp.tanh(c * (h + 0.044715 * h * h * h)))

    # TODO(synk): dropout omitted (module eval semantics -> identity).

    # ---- second linear partial: cast to weight dtype, f32 accumulate ------
    acc_ref[...] += jnp.dot(h.astype(w2_ref.dtype), w2_ref[...],
                            preferred_element_type=jnp.float32)

    @pl.when(k == pl.num_programs(1) - 1)
    def _finalize():
        o_ref[...] = acc_ref[...].astype(o_ref.dtype)


# --------------------------------------------------------------------------- #
# Tile sizing (VMEM-budget + generation aware)                                #
# --------------------------------------------------------------------------- #
def _vmem_work_bytes(tile_m, tile_f, d_model, itemsize):
    work = 2 * itemsize * (tile_m * d_model      # x tile   (double buffered)
                           + d_model * tile_f    # W1 tile  (double buffered)
                           + tile_f              # b1 tile
                           + tile_f * d_model    # W2 tile  (double buffered)
                           + d_model             # b2
                           + tile_m * d_model)   # out tile (double buffered)
    work += 4 * tile_m * d_model                 # f32 accumulator scratch
    work += 2 * 4 * tile_m * tile_f              # f32 hidden + temps
    return work


def _tm_candidates(m, req_tm, itemsize):
    if req_tm is not None:
        tm = max(8, min(req_tm, _round_up(m, 8)))
        # MXU-granularity guard for user-passed sizes; multiples of 8 otherwise
        tm = _round_up(tm, 256) if (tm >= 256 and m >= 256) else _round_up(tm, 8)
        return [tm]
    # AI break-even target: weights are re-streamed once per M tile, so
    # intensity ~ tile_m flop/byte.  1024 (bf16) / 1280 (f32) clears v6e.
    target = 1024 if itemsize <= 2 else 1280
    if m >= 512:
        # guarantee >= 2 M tiles so the "parallel" axis can shard across
        # both TensorCores on v7x.
        tm0 = min(target, _round_up(-(-m // 2), 256))
        return sorted({tm0} | {c for c in (1024, 768, 512, 256) if c <= tm0},
                      reverse=True)
    # small-m path: a single (or few) small tiles, sublane aligned.
    cands, t = [], _round_up(m, 8)
    while True:
        cands.append(t)
        if t <= 8:
            break
        t = max(8, _round_up(t // 2, 8))
    return cands


def _tf_candidates(d_ff, req_tf):
    if req_tf is not None:
        assert d_ff % req_tf == 0, "tile_f must divide d_ff"
        return [req_tf]
    cands = [c for c in (2048, 1024, 512, 256, 128) if d_ff % c == 0]
    return cands if cands else [d_ff]


def _choose_tiles(m, d_model, d_ff, itemsize, vmem_cap, req_tm, req_tf):
    usable = max(16 * _MIB, vmem_cap - 8 * _MIB)     # headroom below physical
    tm_cands = _tm_candidates(m, req_tm, itemsize)
    tf_cands = _tf_candidates(d_ff, req_tf)
    # Prefer the largest tile_m (drives arithmetic intensity), then the
    # largest tile_f that fits; first pass keeps pipelining headroom.
    for num, den in ((3, 4), (1, 1)):
        for tm in tm_cands:
            for tf in tf_cands:
                if _vmem_work_bytes(tm, tf, d_model, itemsize) <= usable * num // den:
                    return tm, tf
    return tm_cands[-1], tf_cands[-1]


# --------------------------------------------------------------------------- #
# Wrapper                                                                     #
# --------------------------------------------------------------------------- #
@functools.partial(jax.jit, static_argnames=("tile_m", "tile_f", "mxu_dtype"))
def positionwise_ffn(x, w1, b1, w2, b2, *, tile_m=None, tile_f=None,
                     mxu_dtype=None):
    """y = gelu_tanh(x @ w1 + b1) @ w2 + b2 over the last dim of x.

    x: (..., d_model); w1: (d_model, d_ff); w2: (d_ff, d_model)
    (weights stored transposed relative to PyTorch nn.Linear.weight).
    Dropout is identity (inference/eval semantics).
    mxu_dtype: optional dtype (e.g. jnp.bfloat16) for the MXU operands;
    accumulation and GELU stay f32, output keeps x.dtype.
    """
    orig_shape = x.shape
    out_dtype = x.dtype
    d_model = orig_shape[-1]
    d_ff = w1.shape[1]

    x2d = x.reshape(-1, d_model)
    m = x2d.shape[0]

    if mxu_dtype is not None:
        x2d = x2d.astype(mxu_dtype)
        w1 = w1.astype(mxu_dtype)
        w2 = w2.astype(mxu_dtype)
    op_dtype = x2d.dtype
    itemsize = jnp.dtype(op_dtype).itemsize

    # ---- generation-aware tile sizing --------------------------------------
    vmem_cap = _vmem_capacity_bytes()
    tile_m, tile_f = _choose_tiles(m, d_model, d_ff, itemsize, vmem_cap,
                                   tile_m, tile_f)
    m_pad = _round_up(m, tile_m)

    if m_pad != m:
        x2d = jnp.pad(x2d, ((0, m_pad - m), (0, 0)))

    b1_2d = b1.reshape(1, d_ff)
    b2_2d = b2.reshape(1, d_model)

    n_i = m_pad // tile_m
    n_k = d_ff // tile_f

    # ---- VMEM budget & cost hint -------------------------------------------
    work = _vmem_work_bytes(tile_m, tile_f, d_model, itemsize)
    vmem_limit = int(min(max(32 * _MIB, work * 3 // 2), vmem_cap - 4 * _MIB))
    vmem_limit = max(vmem_limit, 16 * _MIB)

    cost = pl.CostEstimate(
        flops=4 * m_pad * d_model * d_ff,              # two GEMMs
        transcendentals=m_pad * d_ff,                  # tanh in GELU
        # weights/biases are re-streamed once per M tile
        bytes_accessed=int(itemsize * (2 * m_pad * d_model
                                       + n_i * (2 * d_model * d_ff
                                                + d_ff + d_model))),
    )

    out = pl.pallas_call(
        _ffn_kernel,
        out_shape=jax.ShapeDtypeStruct((m_pad, d_model), out_dtype),
        grid_spec=pltpu.PrefetchScalarGridSpec(
            num_scalar_prefetch=0,
            grid=(n_i, n_k),
            in_specs=[
                pl.BlockSpec((tile_m, d_model), lambda i, k: (i, 0)),   # x
                pl.BlockSpec((d_model, tile_f), lambda i, k: (0, k)),   # W1
                pl.BlockSpec((1, tile_f), lambda i, k: (0, k)),         # b1
                pl.BlockSpec((tile_f, d_model), lambda i, k: (k, 0)),   # W2
                pl.BlockSpec((1, d_model), lambda i, k: (0, 0)),        # b2
            ],
            out_specs=pl.BlockSpec((tile_m, d_model), lambda i, k: (i, 0)),
            scratch_shapes=[pltpu.VMEM((tile_m, d_model), jnp.float32)],
        ),
        compiler_params=pltpu.CompilerParams(
            dimension_semantics=("parallel", "arbitrary"),
            vmem_limit_bytes=vmem_limit),
        cost_estimate=cost,
    )(x2d, w1, b1_2d, w2, b2_2d)

    if m_pad != m:
        out = out[:m]
    return out.reshape(orig_shape)


# --------------------------------------------------------------------------- #
# Reference + tests                                                           #
# --------------------------------------------------------------------------- #
def _reference_ffn(x, w1, b1, w2, b2):
    h = jnp.dot(x, w1) + b1
    c = math.sqrt(2.0 / math.pi)
    h = 0.5 * h * (1.0 + jnp.tanh(c * (h + 0.044715 * h ** 3)))
    return jnp.dot(h, w2) + b2


def _make_params(key, d_model, d_ff, batch, seq, dtype=jnp.float32):
    kx, kw1, kb1, kw2, kb2 = jax.random.split(key, 5)
    x = jax.random.normal(kx, (batch, seq, d_model), dtype=dtype)
    bound1 = 1.0 / math.sqrt(d_model)
    w1 = jax.random.uniform(kw1, (d_model, d_ff), dtype, -bound1, bound1)
    b1 = jax.random.uniform(kb1, (d_ff,), dtype, -bound1, bound1)
    bound2 = 1.0 / math.sqrt(d_ff)
    w2 = jax.random.uniform(kw2, (d_ff, d_model), dtype, -bound2, bound2)
    b2 = jax.random.uniform(kb2, (d_model,), dtype, -bound2, bound2)
    return x, w1, b1, w2, b2


if __name__ == "__main__":
    root = jax.random.PRNGKey(0)
    k1, k2, k3 = jax.random.split(root, 3)

    # ---- test 1: toy shapes implied by the module (single grid step) -------
    x, w1, b1, w2, b2 = _make_params(k1, d_model=32, d_ff=64, batch=2, seq=8)
    y = positionwise_ffn(x, w1, b1, w2, b2)
    jax.block_until_ready(y)
    y_ref = _reference_ffn(x, w1, b1, w2, b2)
    assert y.shape == x.shape
    assert jnp.allclose(y, y_ref, atol=1e-5, rtol=1e-5)

    # ---- test 2: lane-aligned shapes exercising the 2-D grid + row padding -
    x, w1, b1, w2, b2 = _make_params(k2, d_model=128, d_ff=256, batch=2, seq=7)
    y = positionwise_ffn(x, w1, b1, w2, b2, tile_m=8, tile_f=128)
    jax.block_until_ready(y)
    y_ref = _reference_ffn(x, w1, b1, w2, b2)
    assert y.shape == x.shape
    assert jnp.allclose(y, y_ref, atol=5e-3, rtol=5e-3)

    # ---- test 3: bf16 MXU path with auto tile selection ---------------------
    x, w1, b1, w2, b2 = _make_params(k3, d_model=128, d_ff=256, batch=2, seq=16)
    y = positionwise_ffn(x, w1, b1, w2, b2, mxu_dtype=jnp.bfloat16)
    jax.block_until_ready(y)
    y_ref = _reference_ffn(x, w1, b1, w2, b2)
    assert y.shape == x.shape
    assert jnp.allclose(y, y_ref, atol=5e-2, rtol=5e-2)

    print("KERNEL_OK")
</pallas_src>

<mosaic_0001>
module attributes {stable_mosaic.version = 11 : i64} {
  func.func @_ffn_kernel(%arg0: i32, %arg1: i32, %arg2: memref<16x32xf32, #tpu.memory_space<vmem>>, %arg3: memref<32x64xf32, #tpu.memory_space<vmem>>, %arg4: memref<1x64xf32, #tpu.memory_space<vmem>>, %arg5: memref<64x32xf32, #tpu.memory_space<vmem>>, %arg6: memref<1x32xf32, #tpu.memory_space<vmem>>, %arg7: memref<16x32xf32, #tpu.memory_space<vmem>>, %arg8: memref<16x32xf32, #tpu.memory_space<vmem>>) attributes {dimension_semantics = [#tpu.dimension_semantics<parallel>, #tpu.dimension_semantics<arbitrary>], iteration_bounds = array<i64: 1, 1>, scalar_prefetch = 0 : i64, scratch_operands = 1 : i64, tpu.core_type = #tpu.core_type<tc>, window_params = [{transform_indices = @transform_0, window_bounds = array<i64: 16, 32>}, {transform_indices = @transform_1, window_bounds = array<i64: 32, 64>}, {transform_indices = @transform_2, window_bounds = array<i64: 1, 64>}, {transform_indices = @transform_3, window_bounds = array<i64: 64, 32>}, {pipeline_mode = #tpu.pipeline_mode<synchronous>, transform_indices = @transform_4, window_bounds = array<i64: 1, 32>}, {transform_indices = @transform_5, window_bounds = array<i64: 16, 32>}]} {
    %c0_i32 = arith.constant 0 : i32
    %0 = arith.cmpi eq, %arg1, %c0_i32 : i32
    %1 = arith.extui %0 : i1 to i32
    %c0_i32_0 = arith.constant 0 : i32
    %2 = arith.cmpi ne, %1, %c0_i32_0 : i32
    scf.if %2 {
      %c0_19 = arith.constant 0 : index
      %c0_20 = arith.constant 0 : index
      %30 = vector.load %arg6[%c0_19, %c0_20] : memref<1x32xf32, #tpu.memory_space<vmem>>, vector<1x32xf32>
      %31 = vector.shape_cast %30 : vector<1x32xf32> to vector<1x32xf32>
      %32 = vector.broadcast %31 : vector<1x32xf32> to vector<16x32xf32>
      %c0_21 = arith.constant 0 : index
      %c0_22 = arith.constant 0 : index
      %33 = vector.load %arg8[%c0_21, %c0_22] : memref<16x32xf32, #tpu.memory_space<vmem>>, vector<16x32xf32>
      tpu.vector_store %arg8[%c0_21, %c0_22], %32 {strides = array<i32>} : memref<16x32xf32, #tpu.memory_space<vmem>>, vector<16x32xf32>,
    } else {
    }
    %c0 = arith.constant 0 : index
    %c0_1 = arith.constant 0 : index
    %3 = vector.load %arg2[%c0, %c0_1] : memref<16x32xf32, #tpu.memory_space<vmem>>, vector<16x32xf32>
    %c0_2 = arith.constant 0 : index
    %c0_3 = arith.constant 0 : index
    %4 = vector.load %arg3[%c0_2, %c0_3] : memref<32x64xf32, #tpu.memory_space<vmem>>, vector<32x64xf32>
    %cst = arith.constant dense<0.000000e+00> : vector<16x64xf32>
    %5 = tpu.matmul %3, %4, %cst {dimension_numbers = #tpu.dot_dimension_numbers<[1], [0], [0], [1], [0, 0, 1, 1], [], []>} : vector<16x32xf32>, vector<32x64xf32>, vector<16x64xf32> -> vector<16x64xf32>
    %c0_4 = arith.constant 0 : index
    %c0_5 = arith.constant 0 : index
    %6 = vector.load %arg4[%c0_4, %c0_5] : memref<1x64xf32, #tpu.memory_space<vmem>>, vector<1x64xf32>
    %7 = vector.broadcast %6 : vector<1x64xf32> to vector<16x64xf32>
    %8 = arith.addf %5, %7 : vector<16x64xf32>
    %cst_6 = arith.constant 5.000000e-01 : f32
    %9 = vector.broadcast %cst_6 : f32 to vector<16x64xf32>
    %10 = arith.mulf %9, %8 : vector<16x64xf32>
    %cst_7 = arith.constant 4.471500e-02 : f32
    %11 = vector.broadcast %cst_7 : f32 to vector<16x64xf32>
    %12 = arith.mulf %11, %8 : vector<16x64xf32>
    %13 = arith.mulf %12, %8 : vector<16x64xf32>
    %14 = arith.mulf %13, %8 : vector<16x64xf32>
    %15 = arith.addf %8, %14 : vector<16x64xf32>
    %cst_8 = arith.constant 0.797884583 : f32
    %16 = vector.broadcast %cst_8 : f32 to vector<16x64xf32>
    %17 = arith.mulf %16, %15 : vector<16x64xf32>
    %18 = math.tanh %17 : vector<16x64xf32>
    %cst_9 = arith.constant 1.000000e+00 : f32
    %19 = vector.broadcast %cst_9 : f32 to vector<16x64xf32>
    %20 = arith.addf %19, %18 : vector<16x64xf32>
    %21 = arith.mulf %10, %20 : vector<16x64xf32>
    %c0_10 = arith.constant 0 : index
    %c0_11 = arith.constant 0 : index
    %22 = vector.load %arg8[%c0_10, %c0_11] : memref<16x32xf32, #tpu.memory_space<vmem>>, vector<16x32xf32>
    %c0_12 = arith.constant 0 : index
    %c0_13 = arith.constant 0 : index
    %23 = vector.load %arg5[%c0_12, %c0_13] : memref<64x32xf32, #tpu.memory_space<vmem>>, vector<64x32xf32>
    %cst_14 = arith.constant dense<0.000000e+00> : vector<16x32xf32>
    %24 = tpu.matmul %21, %23, %cst_14 {dimension_numbers = #tpu.dot_dimension_numbers<[1], [0], [0], [1], [0, 0, 1, 1], [], []>} : vector<16x64xf32>, vector<64x32xf32>, vector<16x32xf32> -> vector<16x32xf32>
    %25 = arith.addf %22, %24 : vector<16x32xf32>
    %c0_15 = arith.constant 0 : index
    %c0_16 = arith.constant 0 : index
    %26 = vector.load %arg8[%c0_15, %c0_16] : memref<16x32xf32, #tpu.memory_space<vmem>>, vector<16x32xf32>
    tpu.vector_store %arg8[%c0_15, %c0_16], %25 {strides = array<i32>} : memref<16x32xf32, #tpu.memory_space<vmem>>, vector<16x32xf32>,
    %c0_i32_17 = arith.constant 0 : i32
    %27 = arith.cmpi eq, %arg1, %c0_i32_17 : i32
    %28 = arith.extui %27 : i1 to i32
    %c0_i32_18 = arith.constant 0 : i32
    %29 = arith.cmpi ne, %28, %c0_i32_18 : i32
    scf.if %29 {
      %c0_19 = arith.constant 0 : index
      %c0_20 = arith.constant 0 : index
      %30 = vector.load %arg8[%c0_19, %c0_20] : memref<16x32xf32, #tpu.memory_space<vmem>>, vector<16x32xf32>
      %c0_21 = arith.constant 0 : index
      %c0_22 = arith.constant 0 : index
      %31 = vector.load %arg7[%c0_21, %c0_22] : memref<16x32xf32, #tpu.memory_space<vmem>>, vector<16x32xf32>
      tpu.vector_store %arg7[%c0_21, %c0_22], %30 {strides = array<i32>} : memref<16x32xf32, #tpu.memory_space<vmem>>, vector<16x32xf32>,
    } else {
    }
    return
  }
  func.func @transform_0(%arg0: i32, %arg1: i32) -> (i32, i32) {
    %c0_i32 = arith.constant 0 : i32
    %c0_i32_0 = arith.constant 0 : i32
    return %arg0, %c0_i32 : i32, i32
  }
  func.func @transform_1(%arg0: i32, %arg1: i32) -> (i32, i32) {
    %c0_i32 = arith.constant 0 : i32
    %c0_i32_0 = arith.constant 0 : i32
    return %c0_i32, %arg1 : i32, i32
  }
  func.func @transform_2(%arg0: i32, %arg1: i32) -> (i32, i32) {
    %c0_i32 = arith.constant 0 : i32
    %c0_i32_0 = arith.constant 0 : i32
    return %c0_i32, %arg1 : i32, i32
  }
  func.func @transform_3(%arg0: i32, %arg1: i32) -> (i32, i32) {
    %c0_i32 = arith.constant 0 : i32
    %c0_i32_0 = arith.constant 0 : i32
    return %arg1, %c0_i32 : i32, i32
  }
  func.func @transform_4(%arg0: i32, %arg1: i32) -> (i32, i32) {
    %c0_i32 = arith.constant 0 : i32
    %c0_i32_0 = arith.constant 0 : i32
    %c0_i32_1 = arith.constant 0 : i32
    return %c0_i32, %c0_i32_0 : i32, i32
  }
  func.func @transform_5(%arg0: i32, %arg1: i32) -> (i32, i32) {
    %c0_i32 = arith.constant 0 : i32
    %c0_i32_0 = arith.constant 0 : i32
    return %arg0, %c0_i32 : i32, i32
  }
}

</mosaic_0001>

<bundles_post_ra>
// kernel: positionwise_ffn.1
= control target key start
LH: loop header
LB: loop body
LE: loop exit
PB: predicated region body
PF: predicated region fallthrough
CT: control target
= control target key end

     0   :  { %vm32_vm0 = vcmask 261120   ;;  %s440_s0 = inlined_call_operand.vmem [shape: f32[16,32], index: 0, kind: input, shape index: {}]   ;;  %s441_s1 = inlined_call_operand.vmem [shape: f32[32,64], index: 1, kind: input, shape index: {}]   ;;  %s442_s2 = inlined_call_operand.vmem [shape: f32[1,64], index: 2, kind: input, shape index: {}]   ;;  %s443_s3 = inlined_call_operand.vmem [shape: f32[64,32], index: 3, kind: input, shape index: {}]   ;;  %s444_s4 = inlined_call_operand.vmem [shape: f32[1,32], index: 4, kind: input, shape index: {}]   ;;  %s445_s5 = inlined_call_operand.hbm [shape: f32[16,32], index: 5, kind: output, shape index: {}]  }
   0x1   :  { %v40_v0 = vld [vmem:[%s441_s1 + $0x18] sm:$0xff]  ;;  %v39_v1 = vld [vmem:[%s441_s1 + $0x10] sm:$0xff]  ;;  %v35_v2 = vld [vmem:[%s440_s0] sm:$0xff] }
   0x2   :  { %289 = vmatprep.subr.mxu0 %v40_v0  ;;  %v38_v3 = vld [vmem:[%s441_s1 + $0x8] sm:$0xff]  ;;  %297 = vmatprep.mubr.msk.f32.mxu0 %vm32_vm0, %v35_v2 }
   0x3   :  { %290 = vmatpush3.msra.mxu0 %v40_v0 }
   0x4   :  { %10 = vsyncpa [#allocation4], 0  ;;  %291 = vmatprep.subr.mxu0 %v39_v1  ;;  %v37_v4 = vld [vmem:[%s441_s1] sm:$0xff]  ;;  %v36_v5 = vld [vmem:[%s440_s0 + $0x8] sm:$0xff]  ;;  %vm158_vm1 = vcmask 523264  }
   0x5   :  { %292 = vmatpush3.msra.mxu0 %v39_v1  ;;  %v157_v6 = vld [vmem:[%s443_s3 + $0x38] sm:$0xff]  ;;  %v156_v7 = vld [vmem:[%s443_s3 + $0x30] sm:$0xff]  ;;  %v155_v8 = vld [vmem:[%s443_s3 + $0x28] sm:$0xff] }
   0x6   :  { %293 = vmatprep.subr.mxu0 %v38_v3  ;;  %300 = vmatprep.subr.mxu1 %v157_v6  ;;  %v154_v9 = vld [vmem:[%s443_s3 + $0x20] sm:$0xff]  ;;  %v153_v10 = vld [vmem:[%s443_s3 + $0x18] sm:$0xff]  ;;  %v152_v11 = vld [vmem:[%s443_s3 + $0x10] sm:$0xff] }
   0x7   :  { %294 = vmatpush3.msra.mxu0 %v38_v3  ;;  %301 = vmatpush3.msra.mxu1 %v157_v6  ;;  %v151_v12 = vld [vmem:[%s443_s3 + $0x8] sm:$0xff]  ;;  %v150_v13 = vld [vmem:[%s443_s3] sm:$0xff] }
   0x8   :  { %295 = vmatprep.subr.mxu0 %v37_v4  ;;  %302 = vmatprep.subr.mxu1 %v156_v7  ;;  %v267_v14 = vld [vmem:[%s444_s4] ss:$0 sm:$0xff] }
   0x9   :  { %296 = vmatpush3.msra.mxu0 %v37_v4  ;;  %303 = vmatpush3.msra.mxu1 %v156_v7  ;;  %34 = vst.msk [vmem:[#allocation2 + $0x8] sm:$0xff] %vm32_vm0, %v267_v14  ;;  %33 = vst.msk [vmem:[#allocation2] sm:$0xff] %vm32_vm0, %v267_v14  ;;  %v268_v15 = vld [vmem:[%s442_s2] ss:$0 sm:$0xff]  ;;  %s348_s2 = smov [#allocation3]  }
   0xa   :  { %298 = vmatmul.mubr.msk.f32.vlgmr.msra.gmra.mxu0 %vm32_vm0, %v36_v5  ;;  %304 = vmatprep.subr.mxu1 %v155_v8  ;;  %s256_s3 = sshll.u32 %s348_s2, 4  ;;  %s257_s3 = int_to_ptr.vmem [resolvable:$true] %s256_s3 }
   0xb   :  { %305 = vmatpush3.msra.mxu1 %v155_v8  ;;  %s326_s4 = scalar_lea.vmem %s257_s3, 256  ;;  %p331_p1 = scmp.lt.s32.totalorder %s257_s3, %s257_s3 }
   0xc   :  { %306 = vmatprep.subr.mxu1 %v154_v9  ;;  %p327_p0 = scmp.ne.s32.totalorder %s257_s3, %s326_s4  ;;  %p332_p2 = scmp.lt.s32.totalorder %s326_s4, %s326_s4 }
   0xd   :  { %307 = vmatpush3.msra.mxu1 %v154_v9 }
   0xe   :  { %308 = vmatprep.subr.mxu1 %v153_v10  ;;  %p333_p3 = por %p332_p2, %p331_p1 }
   0xf   :  { %309 = vmatpush3.msra.mxu1 %v153_v10 }
  0x10   :  { %310 = vmatprep.subr.mxu1 %v152_v11  ;;  %v149_v38 = vld [vmem:[#allocation2 + $0x8] sm:$0xff]  ;;  %v148_v40 = vld [vmem:[#allocation2] sm:$0xff]  ;;  %p334_p4 = pnand %p333_p3, %p327_p0 }
  0x11   :  { %311 = vmatpush3.msra.mxu1 %v152_v11 }
  0x12   :  { %312 = vmatprep.subr.mxu1 %v151_v12 }
  0x13   :  { %313 = vmatpush3.msra.mxu1 %v151_v12 }
  0x14   :  { %314 = vmatprep.subr.mxu1 %v150_v13 }
  0x15   :  { %315 = vmatpush3.msra.mxu1 %v150_v13 }
  0xca   :  { %v299_v16 = vpop.f32.mrf.mxu0 }
  0xcb   :  { %v127_v17 = vadd.f32 %v299_v16, %v268_v15 }
  0xcc   :  { %v121_v18 = vpop.f32.mrf.mxu0 }
  0xcd   :  { %v133_v19 = vmul.f32 0.044715, %v127_v17  ;;  %v122_v20 = vadd.f32 %v268_v15, %v121_v18  ;;  %v131_v35 = vmul.f32 0.5, %v127_v17 }
  0xcf   :  { %v135_v21 = vmul.f32 %v133_v19, %v127_v17  ;;  %v132_v22 = vmul.f32 0.044715, %v122_v20  ;;  %v130_v33 = vmul.f32 0.5, %v122_v20 }
  0xd1   :  { %v137_v23 = vmul.f32 %v135_v21, %v127_v17  ;;  %v134_v24 = vmul.f32 %v132_v22, %v122_v20 }
  0xd3   :  { %v139_v25 = vadd.f32 %v137_v23, %v127_v17  ;;  %v136_v26 = vmul.f32 %v134_v24, %v122_v20 }
  0xd5   :  { %v138_v27 = vadd.f32 %v136_v26, %v122_v20  ;;  %v141_v28 = vmul.f32 0.7978846, %v139_v25 }
  0xd7   :  { %v140_v29 = vmul.f32 0.7978846, %v138_v27  ;;  %322 = vtanh.f32 %v141_v28 }
  0xd9   :  { %324 = vtanh.f32 %v140_v29 }
  0xe4   :  { %v323_v30 = vpop.eup %322 }
  0xe5   :  { %v145_v32 = vadd.f32 1.0, %v323_v30 }
  0xe6   :  { %v325_v31 = vpop.eup %324 }
  0xe7   :  { %v144_v34 = vadd.f32 1.0, %v325_v31  ;;  %v147_v37 = vmul.f32 %v145_v32, %v131_v35 }
  0xe9   :  { %v146_v36 = vmul.f32 %v144_v34, %v130_v33 }
  0xeb   :  { %316 = vmatprep.mubr.msk.f32.mxu1 %vm158_vm1, %v146_v36 }
  0xec   :  { %317 = vmatmul.mubr.msk.f32.vlgmr.msra.gmra.mxu1 %vm158_vm1, %v147_v37 }
 0x1ac   :  { %v318_v39 = vpop.f32.mrf.mxu1 }
 0x1ad   :  { %v241_v41 = vadd.f32 %v318_v39, %v149_v38 }
 0x1ae   :  { %v231_v42 = vpop.f32.mrf.mxu1 }
 0x1af   :  { %243 = vst.msk [vmem:[#allocation2 + $0x8] sm:$0xff] %vm32_vm0, %v241_v41  ;;  %v240_v43 = vadd.f32 %v231_v42, %v148_v40 }
 0x1b1   :  { %242 = vst.msk [vmem:[#allocation2] sm:$0xff] %vm32_vm0, %v240_v43 }
 0x1b6   :  { %v248_v44 = vld [vmem:[#allocation2 + $0x8] sm:$0xff] }
 0x1b7   :  { %250 = vst.msk [vmem:[#allocation3 + $0x8] sm:$0xff] %vm32_vm0, %v248_v44 }
 0x1b8   :  { %v247_v45 = vld [vmem:[#allocation2] sm:$0xff] }
 0x1b9   :  { %249 = vst.msk [vmem:[#allocation3] sm:$0xff] %vm32_vm0, %v247_v45 }
 0x1ba   :  { %337 = shalt.err (!%p334_p4)
}
 0x1bb   :  { %s349_s23 = smov 128   ;;  %s350_s24 = smov 8  }
 0x1bc   :  { %262 = dma.vmem_to_hbm [thread:$0]  %s257_s3, 256, %s445_s5, [#allocation4], %s349_s23, %s349_s23, %s350_s24  }
 0x1bd   :  { %346 = dma.done.wait [#allocation4], 256  }
 0x1be   :  { %347 = vsyncadd [#allocation4], 4294967040 }
 0x1bf   :  { %266 = vsyncpa [#allocation4], 1 }

</bundles_post_ra>
